<compile_context>
chip_gen: v5e
topology: v5e:2x2
jax: 0.10.0
libtpu: 0.0.40
codegen_flags: <defaults>
</compile_context>

<pallas_src>
import numpy as np
import jax
import jax.numpy as jnp
from jax import lax
from jax.experimental import pallas as pl
from jax.experimental.pallas import tpu as pltpu


def _permute_matmul_kernel(patches_ref, idx_ref, out_ref):
    """One grid step gathers the kept rows for `batch_block` batches.

    patches_ref: (T_seq,  batch_block * C)   VMEM
    idx_ref:     (batch_block, T_keep, 1)    int32 VMEM
    out_ref:     (T_keep, batch_block * C)   VMEM
    """
    t_seq = patches_ref.shape[0]
    t_keep = out_ref.shape[0]
    bb = idx_ref.shape[0]
    c = patches_ref.shape[1] // bb

    # f32 needs the multi-pass split to pass mantissas through the MXU exactly;
    # bf16/f16 one-hot gathers are exact at DEFAULT already (fewer MXU passes).
    precision = (lax.Precision.HIGHEST
                 if patches_ref.dtype == jnp.float32 else lax.Precision.DEFAULT)

    # Source-position iota shared by every batch in this block (hoisted out of loop).
    s_iota = lax.broadcasted_iota(jnp.int32, (t_keep, t_seq), 1)

    for j in range(bb):  # static unroll: bb is small; scheduler overlaps the matmuls
        idx_col = idx_ref[j]                                      # (T_keep, 1)
        onehot = (idx_col == s_iota).astype(patches_ref.dtype)    # (T_keep, T_seq)
        # One-hot rows contain a single exact 1.0, so the matmul reproduces the
        # gathered rows exactly (single nonzero accumulated in the f32 accumulator).
        out_ref[:, j * c:(j + 1) * c] = jnp.dot(
            onehot,
            patches_ref[:, j * c:(j + 1) * c],
            preferred_element_type=jnp.float32,
            precision=precision,
        ).astype(out_ref.dtype)


def _pick_batch_block(B, T_seq, T_keep, C, itemsize, vmem_budget=8 * 1024 * 1024):
    """Largest divisor of B whose double-buffered in+out(+idx) tiles fit the budget."""
    if C % 128 != 0:
        # A partial-width column block needs a lane dim that is a multiple of 128;
        # a single full-width block (bb == B) is always legal.
        # TODO(synk): pad C up to a multiple of 128 instead when B*C is too large.
        return B
    per_batch = 2 * ((T_seq + T_keep) * C * itemsize + T_keep * 4)  # dbl-buffered
    bb = max(1, min(B, vmem_budget // max(per_batch, 1)))
    while B % bb != 0:
        bb -= 1
    return bb


def _gather_keep_pallas(patches, fwd_keep_bm):
    """patches: (T_seq, B, C); fwd_keep_bm: (B, T_keep) int32 -> (T_keep, B, C)."""
    T_seq, B, C = patches.shape
    T_keep = fwd_keep_bm.shape[1]
    if T_keep == 0:
        return jnp.zeros((0, B, C), dtype=patches.dtype)

    bb = _pick_batch_block(B, T_seq, T_keep, C, patches.dtype.itemsize)

    patches_2d = patches.reshape(T_seq, B * C)                 # free, contiguous view
    idx = fwd_keep_bm.reshape(B, T_keep, 1).astype(jnp.int32)  # tiny VMEM side input

    itemsize = patches.dtype.itemsize
    cost = pl.CostEstimate(
        flops=2 * T_keep * T_seq * B * C,
        transcendentals=0,
        bytes_accessed=(T_seq * B * C + T_keep * B * C) * itemsize + B * T_keep * 4,
    )

    out_2d = pl.pallas_call(
        _permute_matmul_kernel,
        out_shape=jax.ShapeDtypeStruct((T_keep, B * C), patches.dtype),
        grid_spec=pltpu.PrefetchScalarGridSpec(
            num_scalar_prefetch=0,
            grid=(B // bb,),
            in_specs=[
                pl.BlockSpec((T_seq, bb * C), lambda b: (0, b)),
                pl.BlockSpec((bb, T_keep, 1), lambda b: (b, 0, 0)),
            ],
            out_specs=pl.BlockSpec((T_keep, bb * C), lambda b: (0, b)),
        ),
        compiler_params=pltpu.CompilerParams(
            dimension_semantics=("parallel",)),
        cost_estimate=cost,
    )(patches_2d, idx)
    return out_2d.reshape(T_keep, B, C)


def _random_indexes(mask_row, rng):
    """Mirror of random_indexes() in the PyTorch module (deterministic RNG)."""
    size = mask_row.shape[0]
    g = np.arange(size)
    unmask = g[mask_row.astype(bool)]
    rng.shuffle(unmask)
    masked = g[np.logical_not(mask_row.astype(bool))]
    rng.shuffle(masked)
    forward = np.concatenate((unmask, masked))
    backward = np.argsort(forward)
    return forward, backward


def patch_shuffle_inference(patches, masks, seed=0):
    """Forward pass of PatchShuffleInference.

    patches: (T_seq, B, C) float
    masks:   (B, T_seq)    {0, 1}
    returns: (patches_kept (T_keep, B, C),
              forward_indexes (T_seq, B) int32,
              backward_indexes (T_seq, B) int32)
    """
    T_seq, B, C = patches.shape
    masks_np = np.asarray(masks)

    # T = sum(masks[0]) -- host-side static slice length (original module's behavior).
    T_keep = int(masks_np[0].astype(bool).sum())

    rng = np.random.RandomState(seed)
    fwd_list, bwd_list = [], []
    for b in range(B):
        f, bk = _random_indexes(masks_np[b], rng)
        fwd_list.append(f)
        bwd_list.append(bk)
    forward_np = np.stack(fwd_list, axis=-1).astype(np.int32)               # (T_seq, B)
    backward_np = np.stack(bwd_list, axis=-1).astype(np.int32)              # (T_seq, B)
    fwd_keep_bm = np.stack(fwd_list, axis=0)[:, :T_keep].astype(np.int32)   # (B, T_keep)

    forward_indexes = jnp.asarray(forward_np)
    backward_indexes = jnp.asarray(backward_np)

    # Hot path: gather only the kept rows, directly in the (T, B, C) layout.
    patches_kept = _gather_keep_pallas(patches, jnp.asarray(fwd_keep_bm))
    return patches_kept, forward_indexes, backward_indexes


if __name__ == "__main__":
    key = jax.random.PRNGKey(0)
    T_seq, B, C = 16, 2, 128   # C multiple of 128 -> lane-dense blocks (realistic embed dim)

    patches = jax.random.normal(key, (T_seq, B, C), dtype=jnp.float32)
    # masks: keep every other patch -> T_keep = 8 for every batch element.
    masks = jnp.tile(jnp.array([1, 0] * (T_seq // 2), dtype=jnp.int32), (B, 1))  # (B, T_seq)

    kept, fwd, bwd = patch_shuffle_inference(patches, masks, seed=0)
    kept = jax.block_until_ready(kept)

    # Reference check against the torch.gather semantics + [:T] slice.
    p_np = np.asarray(patches)
    fwd_np = np.asarray(fwd)
    bwd_np = np.asarray(bwd)
    T_keep = int(np.asarray(masks)[0].sum())
    expected = np.empty((T_keep, B, C), dtype=p_np.dtype)
    for t in range(T_keep):
        for b in range(B):
            expected[t, b, :] = p_np[fwd_np[t, b], b, :]

    assert kept.shape == (T_keep, B, C), kept.shape
    np.testing.assert_allclose(np.asarray(kept), expected, rtol=1e-5, atol=1e-5)
    # backward_indexes must invert forward_indexes per batch.
    for b in range(B):
        assert np.array_equal(fwd_np[:, b][bwd_np[:, b]], np.arange(T_seq))

    print("KERNEL_OK")
</pallas_src>

<mosaic_0001>
module attributes {stable_mosaic.version = 11 : i64} {
  func.func @_permute_matmul_kernel(%arg0: i32, %arg1: memref<16x256xf32, #tpu.memory_space<vmem>>, %arg2: memref<2x8x1xi32, #tpu.memory_space<vmem>>, %arg3: memref<8x256xf32, #tpu.memory_space<vmem>>) attributes {dimension_semantics = [#tpu.dimension_semantics<parallel>], iteration_bounds = array<i64: 1>, scalar_prefetch = 0 : i64, scratch_operands = 0 : i64, tpu.core_type = #tpu.core_type<tc>, window_params = [{transform_indices = @transform_0, window_bounds = array<i64: 16, 256>}, {transform_indices = @transform_1, window_bounds = array<i64: 2, 8, 1>}, {transform_indices = @transform_2, window_bounds = array<i64: 8, 256>}]} {
    %0 = tpu.iota {dimensions = array<i32: 1>} : vector<8x16xi32>
    %c0 = arith.constant 0 : index
    %c0_0 = arith.constant 0 : index
    %c0_1 = arith.constant 0 : index
    %1 = vector.load %arg2[%c0, %c0_0, %c0_1] : memref<2x8x1xi32, #tpu.memory_space<vmem>>, vector<1x8x1xi32>
    %2 = vector.shape_cast %1 : vector<1x8x1xi32> to vector<8x1xi32>
    %3 = vector.broadcast %2 : vector<8x1xi32> to vector<8x16xi32>
    %4 = arith.cmpi eq, %3, %0 : vector<8x16xi32>
    %5 = arith.extui %4 : vector<8x16xi1> to vector<8x16xi32>
    %6 = arith.sitofp %5 : vector<8x16xi32> to vector<8x16xf32>
    %c0_2 = arith.constant 0 : index
    %c0_3 = arith.constant 0 : index
    %7 = vector.load %arg1[%c0_2, %c0_3] : memref<16x256xf32, #tpu.memory_space<vmem>>, vector<16x128xf32>
    %cst = arith.constant dense<0.000000e+00> : vector<8x128xf32>
    %8 = tpu.matmul %6, %7, %cst {dimension_numbers = #tpu.dot_dimension_numbers<[1], [0], [0], [1], [0, 0, 1, 1], [], []>, precision = #tpu.contract_precision<fp32>} : vector<8x16xf32>, vector<16x128xf32>, vector<8x128xf32> -> vector<8x128xf32>
    %c0_4 = arith.constant 0 : index
    %c0_5 = arith.constant 0 : index
    %9 = vector.load %arg3[%c0_4, %c0_5] : memref<8x256xf32, #tpu.memory_space<vmem>>, vector<8x128xf32>
    tpu.vector_store %arg3[%c0_4, %c0_5], %8 {strides = array<i32>} : memref<8x256xf32, #tpu.memory_space<vmem>>, vector<8x128xf32>,
    %c1 = arith.constant 1 : index
    %c0_6 = arith.constant 0 : index
    %c0_7 = arith.constant 0 : index
    %10 = vector.load %arg2[%c1, %c0_6, %c0_7] : memref<2x8x1xi32, #tpu.memory_space<vmem>>, vector<1x8x1xi32>
    %11 = vector.shape_cast %10 : vector<1x8x1xi32> to vector<8x1xi32>
    %12 = vector.broadcast %11 : vector<8x1xi32> to vector<8x16xi32>
    %13 = arith.cmpi eq, %12, %0 : vector<8x16xi32>
    %14 = arith.extui %13 : vector<8x16xi1> to vector<8x16xi32>
    %15 = arith.sitofp %14 : vector<8x16xi32> to vector<8x16xf32>
    %c0_8 = arith.constant 0 : index
    %c128 = arith.constant 128 : index
    %16 = vector.load %arg1[%c0_8, %c128] : memref<16x256xf32, #tpu.memory_space<vmem>>, vector<16x128xf32>
    %cst_9 = arith.constant dense<0.000000e+00> : vector<8x128xf32>
    %17 = tpu.matmul %15, %16, %cst_9 {dimension_numbers = #tpu.dot_dimension_numbers<[1], [0], [0], [1], [0, 0, 1, 1], [], []>, precision = #tpu.contract_precision<fp32>} : vector<8x16xf32>, vector<16x128xf32>, vector<8x128xf32> -> vector<8x128xf32>
    %c0_10 = arith.constant 0 : index
    %c128_11 = arith.constant 128 : index
    %18 = vector.load %arg3[%c0_10, %c128_11] : memref<8x256xf32, #tpu.memory_space<vmem>>, vector<8x128xf32>
    tpu.vector_store %arg3[%c0_10, %c128_11], %17 {strides = array<i32>} : memref<8x256xf32, #tpu.memory_space<vmem>>, vector<8x128xf32>,
    return
  }
  func.func @transform_0(%arg0: i32) -> (i32, i32) {
    %c0_i32 = arith.constant 0 : i32
    %c0_i32_0 = arith.constant 0 : i32
    return %c0_i32, %arg0 : i32, i32
  }
  func.func @transform_1(%arg0: i32) -> (i32, i32, i32) {
    %c0_i32 = arith.constant 0 : i32
    %c0_i32_0 = arith.constant 0 : i32
    %c0_i32_1 = arith.constant 0 : i32
    return %arg0, %c0_i32, %c0_i32_0 : i32, i32, i32
  }
  func.func @transform_2(%arg0: i32) -> (i32, i32) {
    %c0_i32 = arith.constant 0 : i32
    %c0_i32_0 = arith.constant 0 : i32
    return %c0_i32, %arg0 : i32, i32
  }
}

</mosaic_0001>

<bundles_post_ra>
// kernel: tpu_custom_call.1
= control target key start
LH: loop header
LB: loop body
LE: loop exit
PB: predicated region body
PF: predicated region fallthrough
CT: control target
= control target key end

     0   :  { %7 = vsyncpa [#allocation3], 0  ;;  %s502_s0 = inlined_call_operand.hbm [shape: f32[16,256], index: 0, kind: input, shape index: {}]   ;;  %s503_s1 = inlined_call_operand.vmem [shape: s32[2,8,1], index: 1, kind: input, shape index: {}]   ;;  %s504_s2 = inlined_call_operand.hbm [shape: f32[8,256], index: 2, kind: output, shape index: {}]  }
   0x1   :  { %8 = vsyncpa [#allocation4], 0  ;;  %s13_s11 = sshll.u32 %s502_s0, 4  ;;  %s461_s12 = smov [#allocation2]   ;;  %s14_s11 = int_to_ptr.hbm [resolvable:$true] %s13_s11 }
   0x2   :  { %s15_s13 = sshll.u32 %s461_s12, 4  ;;  %s462_s14 = smov 256   ;;  %s16_s13 = int_to_ptr.vmem [resolvable:$true] %s15_s13 }
   0x3   :  { %s463_s15 = smov 16  }
   0x4   :  { %21 = dma.hbm_to_vmem [thread:$0]  %s14_s11, 512, %s16_s13, [#allocation3], %s462_s14, %s462_s14, %s463_s15  }
   0x5   :  { %457 = dma.done.wait [#allocation3], 512  }
   0x6   :  { %458 = vsyncadd [#allocation3], 4294966784  ;;  %v464_v0 = vmov 0   ;;  %v30_v1 = vld [vmem:[%s503_s1] sm:$0xff]  ;;  %v38_v2 = vld [vmem:[#allocation2 + $0x10] sm:$0xff]  ;;  %v28_v27 = vlaneseq  ;;  %vm39_vm0 = vcmask 130048  }
   0x7   :  { %408 = vset.pattern.permute.xlu0 %v464_v0  ;;  %v57_v3 = vand.u32 4294901760, %v38_v2  ;;  %v397_v6 = vld [vmem:[%s503_s1 + $0x8] sm:$0xff]  ;;  %v37_v9 = vld [vmem:[#allocation2] sm:$0xff]  ;;  %v212_v15 = vld [vmem:[#allocation2 + $0x18] sm:$0xff]  ;;  %v465_v30 = vmov 0.0   ;;  %s466_s1 = smov [#allocation5]  }
   0x8   :  { %32 = vperm.xlu0 %408, %v30_v1   ;;  %v59_v10 = vand.u32 4294901760, %v37_v9  ;;  %v230_v16 = vand.u32 4294901760, %v212_v15  ;;  %v211_v17 = vld [vmem:[#allocation2 + $0x8] sm:$0xff]  ;;  %v29_v28 = vand.u32 127, %v28_v27  ;;  %s381_s19 = sshll.u32 %s466_s1, 4  ;;  %s383_s22 = sshll.u32 %s504_s2, 4  ;;  %s382_s19 = int_to_ptr.vmem [resolvable:$true] %s381_s19  ;;  %s384_s22 = int_to_ptr.hbm [resolvable:$true] %s383_s22 }
   0x9   :  { %v85_v4 = vsub.f32 %v38_v2, %v57_v3  ;;  %142 = vmatpush.msra.mxu3 %v57_v3  ;;  %58 = vmatpush.msra.mxu0 %v57_v3  ;;  %v232_v19 = vand.u32 4294901760, %v211_v17 }
   0xa   :  { %v91_v11 = vsub.f32 %v37_v9, %v59_v10  ;;  %v258_v18 = vsub.f32 %v212_v15, %v230_v16 }
   0xb   :  { %v86_v5 = vand.u32 4294901760, %v85_v4  ;;  %117 = vmatpush.msra.mxu2 %v85_v4  ;;  %144 = vmatpush.msra.mxu3 %v59_v10  ;;  %v264_v21 = vsub.f32 %v211_v17, %v232_v19 }
   0xc   :  { %60 = vmatpush.msra.mxu0 %v59_v10  ;;  %v92_v12 = vand.u32 4294901760, %v91_v11  ;;  %v259_v20 = vand.u32 4294901760, %v258_v18 }
   0xd   :  { %v87_v7 = vsub.f32 %v85_v4, %v86_v5  ;;  %120 = vmatpush.msra.mxu2 %v91_v11  ;;  %v265_v23 = vand.u32 4294901760, %v264_v21 }
   0xe   :  { %169 = vmatpush.msrb.mxu0 %v86_v5  ;;  %v93_v13 = vsub.f32 %v91_v11, %v92_v12  ;;  %v260_v22 = vsub.f32 %v258_v18, %v259_v20 }
   0xf   :  { %v88_v8 = vand.u32 4294901760, %v87_v7  ;;  %231 = vmatpush.msrb.mxu2 %v230_v16  ;;  %v266_v25 = vsub.f32 %v264_v21, %v265_v23 }
  0x10   :  { %206 = vperm.xlu0 %408, %v397_v6   ;;  %173 = vmatpush.msrb.mxu0 %v92_v12  ;;  %v94_v14 = vand.u32 4294901760, %v93_v13  ;;  %v261_v24 = vand.u32 4294901760, %v260_v22 }
  0x11   :  { %89 = vmatpush.msra.mxu1 %v88_v8  ;;  %233 = vmatpush.msrb.mxu2 %v232_v19  ;;  %v267_v26 = vand.u32 4294901760, %v266_v25 }
  0x12   :  { %262 = vmatpush.msrb.mxu3 %v261_v24 }
  0x13   :  { %95 = vmatpush.msra.mxu1 %v94_v14 }
  0x14   :  { %268 = vmatpush.msrb.mxu3 %v267_v26 }
  0x15   :  { %194 = vmatpush.msrb.mxu1 %v57_v3 }
  0x17   :  { %196 = vmatpush.msrb.mxu1 %v59_v10 }
  0x7a   :  { %v33_v29 = vpop.permute.xlu0 %32 }
  0x7b   :  { %vm34_vm1 = vcmp.eq.s32.totalorder %v33_v29, %v29_v28 }
  0x7c   :  { %v393_v31 = vsel %vm34_vm1, 1.0, %v465_v30 }
  0x7d   :  { %394 = vmatmul.msk.f32.vlgmr.msra.gmra.mxu1 %vm39_vm0, %v393_v31  ;;  %v41_v32 = vsel %vm39_vm0, %v393_v31, 0 }
  0x7e   :  { %v62_v33 = vsub.f32 %v41_v32, %v41_v32  ;;  %315 = vmatpush.msra.mxu1 %v230_v16 }
  0x80   :  { %123 = vmatmul.f32.vlgmr.msra.gmra.mxu2 %v62_v33  ;;  %v63_v34 = vand.u32 4294901760, %v62_v33  ;;  %317 = vmatpush.msra.mxu1 %v232_v19 }
  0x81   :  { %342 = vmatpush.msra.mxu2 %v259_v20 }
  0x82   :  { %148 = vmatmul.f32.vlgmr.msra.gmra.mxu3 %v63_v34  ;;  %v207_v35 = vpop.permute.xlu0 %206  ;;  %v64_v36 = vsub.f32 %v62_v33, %v63_v34 }
  0x83   :  { %vm208_vm2 = vcmp.eq.s32.totalorder %v207_v35, %v29_v28  ;;  %367 = vmatpush.msra.mxu3 %v230_v16  ;;  %346 = vmatpush.msra.mxu2 %v265_v23 }
  0x84   :  { %v398_v37 = vsel %vm208_vm2, 1.0, %v465_v30  ;;  %v65_v38 = vand.u32 4294901760, %v64_v36 }
  0x85   :  { %v214_v39 = vsel %vm39_vm0, %v398_v37, 0  ;;  %396 = vmatmul.msk.f32.vlgmr.msrb.gmra.mxu1 %vm39_vm0, %v393_v31  ;;  %369 = vmatpush.msra.mxu3 %v232_v19 }
  0x86   :  { %v235_v40 = vsub.f32 %v214_v39, %v214_v39  ;;  %66 = vmatmul.f32.vlgmr.msra.gmra.mxu0 %v65_v38 }
  0x87   :  { %290 = vmatpush.msra.mxu0 %v258_v18 }
  0x88   :  { %v236_v41 = vand.u32 4294901760, %v235_v40 }
  0x89   :  { %293 = vmatpush.msra.mxu0 %v264_v21 }
  0x8a   :  { %399 = vmatmul.msk.f32.vlgmr.msrb.gmra.mxu3 %vm39_vm0, %v398_v37  ;;  %v237_v42 = vsub.f32 %v235_v40, %v236_v41 }
  0x8c   :  { %v238_v43 = vand.u32 4294901760, %v237_v42 }
  0x8d   :  { %321 = vmatmul.f32.vlgmr.msra.gmra.mxu1 %v236_v41 }
  0x8e   :  { %395 = vmatmul.msk.f32.vlgmr.msrb.gmra.mxu0 %vm39_vm0, %v393_v31  ;;  %239 = vmatmul.f32.vlgmr.msrb.gmra.mxu2 %v238_v43 }
  0x92   :  { %401 = vmatmul.msk.f32.vlgmr.msra.gmra.mxu3 %vm39_vm0, %v398_v37 }
  0x96   :  { %296 = vmatmul.f32.vlgmr.msra.gmra.mxu0 %v235_v40  ;;  %400 = vmatmul.msk.f32.vlgmr.msra.gmra.mxu2 %vm39_vm0, %v398_v37 }
  0xfa   :  { %v98_v44 = vpop.f32.mrf.mxu1 }
 0x102   :  { %v199_v53 = vpop.f32.mrf.mxu1 }
 0x103   :  { %v67_v45 = vpop.f32.mrf.mxu0  ;;  %v124_v47 = vpop.f32.mrf.mxu2 }
 0x104   :  { %v99_v46 = vadd.f32 %v98_v44, %v67_v45 }
 0x105   :  { %v149_v49 = vpop.f32.mrf.mxu3 }
 0x106   :  { %v125_v48 = vadd.f32 %v124_v47, %v99_v46 }
 0x108   :  { %v150_v50 = vadd.f32 %v149_v49, %v125_v48 }
 0x10a   :  { %v322_v60 = vpop.f32.mrf.mxu1 }
 0x10b   :  { %v176_v51 = vpop.f32.mrf.mxu0 }
 0x10c   :  { %v177_v52 = vadd.f32 %v176_v51, %v150_v50 }
 0x10d   :  { %v271_v55 = vpop.f32.mrf.mxu3 }
 0x10e   :  { %v200_v54 = vadd.f32 %v199_v53, %v177_v52 }
 0x110   :  { %202 = vst [vmem:[#allocation5] sm:$0xff] %v200_v54 }
 0x111   :  { %v240_v56 = vpop.f32.mrf.mxu2 }
 0x112   :  { %v272_v57 = vadd.f32 %v271_v55, %v240_v56 }
 0x113   :  { %v297_v58 = vpop.f32.mrf.mxu0 }
 0x114   :  { %v298_v59 = vadd.f32 %v297_v58, %v272_v57 }
 0x115   :  { %v372_v0 = vpop.f32.mrf.mxu3 }
 0x116   :  { %v323_v61 = vadd.f32 %v322_v60, %v298_v59 }
 0x119   :  { %v349_v62 = vpop.f32.mrf.mxu2 }
 0x11a   :  { %v350_v63 = vadd.f32 %v349_v62, %v323_v61 }
 0x11c   :  { %v373_v1 = vadd.f32 %v372_v0, %v350_v63 }
 0x11e   :  { %375 = vst [vmem:[#allocation5 + $0x8] sm:$0xff] %v373_v1 }
 0x11f   :  { %386 = dma.vmem_to_hbm [thread:$0]  %s382_s19, 256, %s384_s22, [#allocation4]  }
 0x120   :  { %459 = dma.done.wait [#allocation4], 256  }
 0x121   :  { %460 = vsyncadd [#allocation4], 4294967040 }
 0x122   :  { %391 = vsyncpa [#allocation3], 1 }
 0x123   :  { %392 = vsyncpa [#allocation4], 1 }

</bundles_post_ra>
